<compile_context>
chip_gen: v7x
topology: tpu7x:2x2x1
jax: 0.10.0
libtpu: 0.0.40
codegen_flags: <defaults>
</compile_context>

<pallas_src>
import numpy as np
import jax
import jax.numpy as jnp
from jax import lax
from jax.experimental import pallas as pl
from jax.experimental.pallas import tpu as pltpu

LANES = 128


def _align8(r):
    return ((r + 7) // 8) * 8


def make_mycnn_forward(input_width, w1, b1, w2, b2, pool_size, W1, c1, W2, c2):
    """One-time parameter composition + a jitted fused forward.

    input_width : W of the (N, C, H, W) input
    w1 : (G, C, H, K1) Conv2d weight (full-height kernel),  b1 : (G,)
    w2 : (1, G, K2)    Conv1d weight,                       b2 : (1,)
    W1 : (Y3, HID)     first Linear (input-major layout),   c1 : (HID,)
    W2 : (HID, NCLS)   second Linear,                       c2 : (NCLS,)
    Returns forward(x) -> (N, NCLS) f32 logits.
    """
    w1n = np.asarray(w1, np.float32)
    b1n = np.asarray(b1, np.float32)
    w2n = np.asarray(w2, np.float32)
    b2n = np.asarray(b2, np.float32)
    W1n = np.asarray(W1, np.float32)
    c1n = np.asarray(c1, np.float32)
    W2n = np.asarray(W2, np.float32)
    c2n = np.asarray(c2, np.float32)

    G, C, H, K1 = w1n.shape
    K2 = w2n.shape[2]
    Win = int(input_width)
    Keff = K1 + K2 - 1
    Y1 = Win - K1 + 1
    Y2 = Y1 - K2 + 1
    Y3 = Y2 // pool_size
    assert Y1 > 0 and Y2 > 0, "input width must be >= kernel1_size + kernel2_size - 1"
    assert Y3 > 0, "AvgPool1d output is empty (Y2 < pool_size)"
    HID = W1n.shape[1]
    NCLS = W2n.shape[1]
    assert Y3 <= LANES and HID <= LANES and NCLS <= LANES, \
        "padding scheme assumes Y3/HID/NCLS each fit in one 128-lane vreg"
    CHW = C * H * Win

    # ---------- one-time composition (host numpy; NOT on the per-call path) ----------
    # conv2d ∘ conv1d  ->  effective full-height kernel of width Keff + folded bias.
    w_eff = np.zeros((C, H, Keff), np.float32)
    for k1 in range(K1):
        for k2 in range(K2):
            w_eff[:, :, k1 + k2] += np.einsum("g,gch->ch", w2n[0, :, k2], w1n[:, :, :, k1])
    b_eff = float(b2n[0] + np.dot(b1n, w2n[0].sum(axis=1)))

    # Fold the average pool too (linearity): dense Toeplitz-style weight so that
    #   d[n, y3] = sum_{c,h,w} x[n,c,h,w] * Wd[(c,h,w), y3] + b_eff
    Wd = np.zeros((C, H, Win, Y3), np.float32)
    inv_p = 1.0 / pool_size
    for y3 in range(Y3):
        for p in range(pool_size):
            for j in range(Keff):
                Wd[:, :, y3 * pool_size + p + j, y3] += inv_p * w_eff[:, :, j]
    Wd_flat = Wd.reshape(CHW, Y3)

    # Pack everything into one (R, 128) f32 buffer -> 2 input DMAs total (x + params).
    off_wd = 0
    off_b = _align8(off_wd + CHW)        # folded conv-stack bias row
    off_w1 = _align8(off_b + 1)          # 128-row padded Linear-1 weight
    off_c1 = off_w1 + LANES              # Linear-1 bias row
    off_w2 = _align8(off_c1 + 1)         # 128-row padded Linear-2 weight
    off_c2 = off_w2 + LANES              # Linear-2 bias row
    R_tot = _align8(off_c2 + 1)

    packed = np.zeros((R_tot, LANES), np.float32)
    packed[off_wd:off_wd + CHW, :Y3] = Wd_flat
    packed[off_b, :Y3] = b_eff
    packed[off_w1:off_w1 + Y3, :HID] = W1n
    packed[off_c1, :HID] = c1n
    packed[off_w2:off_w2 + HID, :NCLS] = W2n
    packed[off_c2, :NCLS] = c2n
    params = jnp.asarray(packed)         # moved to device once, reused every call

    # ---------- the fused kernel: 3 MXU matmuls + 2 LeakyReLUs, all f32 ----------
    def kernel(x_ref, p_ref, o_ref):
        xf = x_ref[...]                                                 # (N, CHW) f32
        # DynamicLayer: conv2d∘conv1d∘avgpool as ONE matmul over raw x bytes.
        d = jnp.dot(xf, p_ref[off_wd:off_wd + CHW, :],
                    preferred_element_type=jnp.float32)                 # (N, 128)
        d = d + p_ref[off_b:off_b + 1, :]                               # folded bias (f32)
        d = jnp.where(d >= 0, d, 0.01 * d)                              # LeakyReLU
        # StaticLayer: two clean K=128 MXU passes; padded lanes stay exactly 0.
        h = jnp.dot(d, p_ref[off_w1:off_w1 + LANES, :],
                    preferred_element_type=jnp.float32)                 # (N, 128)
        h = h + p_ref[off_c1:off_c1 + 1, :]
        h = jnp.where(h >= 0, h, 0.01 * h)
        out = jnp.dot(h, p_ref[off_w2:off_w2 + LANES, :],
                      preferred_element_type=jnp.float32)               # (N, 128)
        out = out + p_ref[off_c2:off_c2 + 1, :]
        o_ref[...] = out.astype(o_ref.dtype)                            # lane-dense store

    @jax.jit
    def forward(x):
        N = x.shape[0]
        x_flat = x.reshape(N, CHW)     # pure metadata reshape (row-major contiguous)
        out_pad = pl.pallas_call(
            kernel,
            out_shape=jax.ShapeDtypeStruct((N, LANES), jnp.float32),
            grid=(1,),
            in_specs=[
                pl.BlockSpec((N, CHW), lambda i: (0, 0)),        # raw flattened input
                pl.BlockSpec((R_tot, LANES), lambda i: (0, 0)),  # packed parameters
            ],
            out_specs=pl.BlockSpec((N, LANES), lambda i: (0, 0)),
            compiler_params=pltpu.CompilerParams(
                dimension_semantics=("arbitrary",)),
        )(x_flat, params)
        return out_pad[:, :NCLS]       # drop the lane padding (tiny fused slice)

    return forward


def mycnn_ref(x, w1, b1, w2, b2, pool_size, W1, c1, W2, c2):
    """Pure-JAX reference mirroring the PyTorch MyCNN (f32, HIGHEST precision)."""
    hp = lax.Precision.HIGHEST
    z1 = lax.conv_general_dilated(
        x, w1, window_strides=(1, 1), padding="VALID",
        dimension_numbers=("NCHW", "OIHW", "NCHW"),
        precision=hp) + b1[None, :, None, None]
    N, G, _, Y1 = z1.shape
    z1 = z1.reshape(N, G, Y1)                                    # Flatten(2)
    z2 = lax.conv_general_dilated(
        z1, w2, window_strides=(1,), padding="VALID",
        dimension_numbers=("NCH", "OIH", "NCH"),
        precision=hp) + b2[None, :, None]
    z2 = z2.reshape(N, -1)                                       # Flatten(1)
    Y2 = z2.shape[1]
    Y3 = Y2 // pool_size
    z3 = z2[:, :Y3 * pool_size].reshape(N, Y3, pool_size).mean(-1)   # AvgPool1d
    d = jnp.where(z3 >= 0, z3, 0.01 * z3)                        # LeakyReLU
    h = jnp.dot(d, W1, precision=hp) + c1[None, :]               # Linear 1
    h = jnp.where(h >= 0, h, 0.01 * h)                           # LeakyReLU
    return jnp.dot(h, W2, precision=hp) + c2[None, :]            # Linear 2


if __name__ == "__main__":
    # Small shapes consistent with the module: x is (N, C, H, W) NCHW; the Conv2d
    # kernel spans the full height H.
    N, C, H, W = 2, 4, 8, 16
    kernel1_size, out_groups, kernel2_size, pool_size = 3, 8, 3, 2
    hidden_layers = 32
    num_classes = 4   # TODO(synk): len(label2num) is not given in the spec; fixed to 4 here.

    Y3 = (W - kernel1_size - kernel2_size + 2) // pool_size      # DynamicLayer.output_size

    key = jax.random.PRNGKey(0)
    kx, kw1, kb1, kw2, kb2, kW1, kc1, kW2, kc2 = jax.random.split(key, 9)
    x = jax.random.normal(kx, (N, C, H, W), jnp.float32)
    w1 = 0.1 * jax.random.normal(kw1, (out_groups, C, H, kernel1_size), jnp.float32)
    b1 = 0.1 * jax.random.normal(kb1, (out_groups,), jnp.float32)
    w2 = 0.1 * jax.random.normal(kw2, (1, out_groups, kernel2_size), jnp.float32)
    b2 = 0.1 * jax.random.normal(kb2, (1,), jnp.float32)
    W1 = 0.1 * jax.random.normal(kW1, (Y3, hidden_layers), jnp.float32)
    c1 = 0.1 * jax.random.normal(kc1, (hidden_layers,), jnp.float32)
    W2 = 0.1 * jax.random.normal(kW2, (hidden_layers, num_classes), jnp.float32)
    c2 = 0.1 * jax.random.normal(kc2, (num_classes,), jnp.float32)

    # One-time parameter composition, then a jitted per-call path.
    forward = make_mycnn_forward(W, w1, b1, w2, b2, pool_size, W1, c1, W2, c2)
    out = jax.block_until_ready(forward(x))

    ref = mycnn_ref(x, w1, b1, w2, b2, pool_size, W1, c1, W2, c2)
    # All-f32 kernel (no bf16 operands) -> tolerance tightened vs the previous 1e-2.
    np.testing.assert_allclose(np.asarray(out), np.asarray(ref), rtol=2e-3, atol=2e-4)

    print("KERNEL_OK")
</pallas_src>

<mosaic_0001>
module attributes {stable_mosaic.version = 11 : i64} {
  func.func @kernel(%arg0: i32, %arg1: memref<2x512xf32, #tpu.memory_space<vmem>>, %arg2: memref<792x128xf32, #tpu.memory_space<vmem>>, %arg3: memref<2x128xf32, #tpu.memory_space<vmem>>) attributes {dimension_semantics = [#tpu.dimension_semantics<arbitrary>], iteration_bounds = array<i64: 1>, scalar_prefetch = 0 : i64, scratch_operands = 0 : i64, tpu.core_type = #tpu.core_type<tc>, window_params = [{pipeline_mode = #tpu.pipeline_mode<synchronous>, transform_indices = @transform_0, window_bounds = array<i64: 2, 512>}, {pipeline_mode = #tpu.pipeline_mode<synchronous>, transform_indices = @transform_1, window_bounds = array<i64: 792, 128>}, {pipeline_mode = #tpu.pipeline_mode<synchronous>, transform_indices = @transform_2, window_bounds = array<i64: 2, 128>}]} {
    %c0 = arith.constant 0 : index
    %c0_0 = arith.constant 0 : index
    %0 = vector.load %arg1[%c0, %c0_0] : memref<2x512xf32, #tpu.memory_space<vmem>>, vector<2x512xf32>
    %c0_1 = arith.constant 0 : index
    %c0_2 = arith.constant 0 : index
    %1 = vector.load %arg2[%c0_1, %c0_2] : memref<792x128xf32, #tpu.memory_space<vmem>>, vector<512x128xf32>
    %cst = arith.constant dense<0.000000e+00> : vector<2x128xf32>
    %2 = tpu.matmul %0, %1, %cst {dimension_numbers = #tpu.dot_dimension_numbers<[1], [0], [0], [1], [0, 0, 1, 1], [], []>} : vector<2x512xf32>, vector<512x128xf32>, vector<2x128xf32> -> vector<2x128xf32>
    %c512 = arith.constant 512 : index
    %c0_3 = arith.constant 0 : index
    %3 = vector.load %arg2[%c512, %c0_3] : memref<792x128xf32, #tpu.memory_space<vmem>>, vector<1x128xf32>
    %4 = vector.broadcast %3 : vector<1x128xf32> to vector<2x128xf32>
    %5 = arith.addf %2, %4 : vector<2x128xf32>
    %cst_4 = arith.constant 0.000000e+00 : f32
    %6 = vector.broadcast %cst_4 : f32 to vector<2x128xf32>
    %7 = arith.cmpf oge, %5, %6 : vector<2x128xf32>
    %cst_5 = arith.constant 0.00999999977 : f32
    %8 = vector.broadcast %cst_5 : f32 to vector<2x128xf32>
    %9 = arith.mulf %8, %5 : vector<2x128xf32>
    %10 = arith.select %7, %5, %9 : vector<2x128xi1>, vector<2x128xf32>
    %c520 = arith.constant 520 : index
    %c0_6 = arith.constant 0 : index
    %11 = vector.load %arg2[%c520, %c0_6] : memref<792x128xf32, #tpu.memory_space<vmem>>, vector<128x128xf32>
    %cst_7 = arith.constant dense<0.000000e+00> : vector<2x128xf32>
    %12 = tpu.matmul %10, %11, %cst_7 {dimension_numbers = #tpu.dot_dimension_numbers<[1], [0], [0], [1], [0, 0, 1, 1], [], []>} : vector<2x128xf32>, vector<128x128xf32>, vector<2x128xf32> -> vector<2x128xf32>
    %c648 = arith.constant 648 : index
    %c0_8 = arith.constant 0 : index
    %13 = vector.load %arg2[%c648, %c0_8] : memref<792x128xf32, #tpu.memory_space<vmem>>, vector<1x128xf32>
    %14 = vector.broadcast %13 : vector<1x128xf32> to vector<2x128xf32>
    %15 = arith.addf %12, %14 : vector<2x128xf32>
    %cst_9 = arith.constant 0.000000e+00 : f32
    %16 = vector.broadcast %cst_9 : f32 to vector<2x128xf32>
    %17 = arith.cmpf oge, %15, %16 : vector<2x128xf32>
    %cst_10 = arith.constant 0.00999999977 : f32
    %18 = vector.broadcast %cst_10 : f32 to vector<2x128xf32>
    %19 = arith.mulf %18, %15 : vector<2x128xf32>
    %20 = arith.select %17, %15, %19 : vector<2x128xi1>, vector<2x128xf32>
    %c656 = arith.constant 656 : index
    %c0_11 = arith.constant 0 : index
    %21 = vector.load %arg2[%c656, %c0_11] : memref<792x128xf32, #tpu.memory_space<vmem>>, vector<128x128xf32>
    %cst_12 = arith.constant dense<0.000000e+00> : vector<2x128xf32>
    %22 = tpu.matmul %20, %21, %cst_12 {dimension_numbers = #tpu.dot_dimension_numbers<[1], [0], [0], [1], [0, 0, 1, 1], [], []>} : vector<2x128xf32>, vector<128x128xf32>, vector<2x128xf32> -> vector<2x128xf32>
    %c784 = arith.constant 784 : index
    %c0_13 = arith.constant 0 : index
    %23 = vector.load %arg2[%c784, %c0_13] : memref<792x128xf32, #tpu.memory_space<vmem>>, vector<1x128xf32>
    %24 = vector.broadcast %23 : vector<1x128xf32> to vector<2x128xf32>
    %25 = arith.addf %22, %24 : vector<2x128xf32>
    %c0_14 = arith.constant 0 : index
    %c0_15 = arith.constant 0 : index
    %26 = vector.load %arg3[%c0_14, %c0_15] : memref<2x128xf32, #tpu.memory_space<vmem>>, vector<2x128xf32>
    tpu.vector_store %arg3[%c0_14, %c0_15], %25 {strides = array<i32>} : memref<2x128xf32, #tpu.memory_space<vmem>>, vector<2x128xf32>,
    return
  }
  func.func @transform_0(%arg0: i32) -> (i32, i32) {
    %c0_i32 = arith.constant 0 : i32
    %c0_i32_0 = arith.constant 0 : i32
    %c0_i32_1 = arith.constant 0 : i32
    return %c0_i32, %c0_i32_0 : i32, i32
  }
  func.func @transform_1(%arg0: i32) -> (i32, i32) {
    %c0_i32 = arith.constant 0 : i32
    %c0_i32_0 = arith.constant 0 : i32
    %c0_i32_1 = arith.constant 0 : i32
    return %c0_i32, %c0_i32_0 : i32, i32
  }
  func.func @transform_2(%arg0: i32) -> (i32, i32) {
    %c0_i32 = arith.constant 0 : i32
    %c0_i32_0 = arith.constant 0 : i32
    %c0_i32_1 = arith.constant 0 : i32
    return %c0_i32, %c0_i32_0 : i32, i32
  }
}

</mosaic_0001>

<bundles_post_ra>
// kernel: forward.1
= control target key start
LH: loop header
LB: loop body
LE: loop exit
PB: predicated region body
PF: predicated region fallthrough
CT: control target
= control target key end

     0   :  { %7 = vsyncpa [#allocation3], 0  ;;  %s874_s0 = inlined_call_operand.vmem [shape: f32[2,512], index: 0, kind: input, shape index: {}]   ;;  %s875_s1 = inlined_call_operand.hbm [shape: f32[792,128], index: 1, kind: input, shape index: {}]   ;;  %s876_s2 = inlined_call_operand.hbm [shape: f32[2,128], index: 2, kind: output, shape index: {}]  }
   0x1   :  { %8 = vsyncpa [#allocation4], 0  ;;  %s808_s9 = smov [#allocation2]   ;;  %s760_s13 = scalar_lea.hbm %s875_s1, 12672 }
   0x2   :  { %s16_s10 = sshll.u32 %s808_s9, 4  ;;  %p761_p0 = scmp.ne.s32.totalorder %s875_s1, %s760_s13  ;;  %s17_s10 = int_to_ptr.vmem [resolvable:$true] %s16_s10 }
   0x3   :  { %p764_p1 = scmp.lt.u32.totalorder %s760_s13, %s875_s1 }
   0x5   :  { %p766_p2 = pnand %p764_p1, %p761_p0 }
   0x7   :  { %769 = shalt.err (!%p766_p2)
}
   0x8   :  { %s770_s18 = scalar_lea.vmem %s17_s10, 12672  ;;  %p775_p4 = scmp.lt.s32.totalorder %s17_s10, %s17_s10 }
   0x9   :  { %p771_p3 = scmp.ne.s32.totalorder %s17_s10, %s770_s18  ;;  %p776_p5 = scmp.lt.s32.totalorder %s770_s18, %s770_s18 }
   0xb   :  { %p777_p6 = por %p776_p5, %p775_p4 }
   0xd   :  { %p778_p7 = pnand %p777_p6, %p771_p3 }
   0xf   :  { %781 = shalt.err (!%p778_p7)
}
  0x10   :  { %s809_s19 = smov 128   ;;  %s810_s20 = smov 8  }
  0x11   :  { %22 = dma.hbm_to_vmem [thread:$0]  %s875_s1, 12672, %s17_s10, [#allocation3], %s809_s19, %s809_s19, %s810_s20  }
  0x12   :  { %804 = dma.done.wait [#allocation3], 12672  }
  0x13   :  { %805 = vsyncadd [#allocation3], 4294954624  ;;  %v43_v0 = vld [vmem:[#allocation2 + $0x80] sm:$0xff]  ;;  %v44_v1 = vld [vmem:[#allocation2 + $0x88] sm:$0xff]  ;;  %v811_v47 = vmov 1983009808   ;;  %v101_v49 = vlaneseq }
  0x14   :  { %v27_v2 = vld [vmem:[#allocation2] sm:$0xff]  ;;  %v639_v3 = vpack.c.bf16 %v44_v1, %v43_v0  ;;  %v28_v4 = vld [vmem:[#allocation2 + $0x8] sm:$0xff]  ;;  %v45_v11 = vld [vmem:[#allocation2 + $0x90] sm:$0xff]  ;;  %v99_v48 = vunpack.c.l.s4 %v811_v47  ;;  %v812_v47 = vmov 0.0|0.0   ;;  %vm813_vm0 = vmmov 0  }
  0x15   :  { %v75_v5 = vld [vmem:[#allocation2 + $0x180] sm:$0xff]  ;;  %v76_v6 = vld [vmem:[#allocation2 + $0x188] sm:$0xff]  ;;  %v641_v7 = vpack.c.bf16 %v28_v4, %v27_v2  ;;  %v46_v13 = vld [vmem:[#allocation2 + $0x98] sm:$0xff]  ;;  %v102_v0 = vshrl.u32 %v101_v49, 7 }
  0x16   :  { %v671_v8 = vpack.c.bf16 %v76_v6, %v75_v5  ;;  %v59_v9 = vld [vmem:[#allocation2 + $0x100] sm:$0xff]  ;;  %v60_v10 = vld [vmem:[#allocation2 + $0x108] sm:$0xff]  ;;  %640 = vmatprep.subr.bf16.mxu0 %v639_v3  ;;  %v29_v14 = vld [vmem:[#allocation2 + $0x10] sm:$0xff]  ;;  %v643_v16 = vpack.c.bf16 %v46_v13, %v45_v11  ;;  %v100_v63 = vunpack.c.0.s8 %v99_v48 }
  0x17   :  { %v673_v12 = vpack.c.bf16 %v60_v10, %v59_v9  ;;  %v30_v15 = vld [vmem:[#allocation2 + $0x18] sm:$0xff]  ;;  %642 = vmatpush3.bf16.msra.mxu0 %v641_v7  ;;  %v77_v18 = vld [vmem:[#allocation2 + $0x190] sm:$0xff]  ;;  %v47_v23 = vld [vmem:[#allocation2 + $0xa0] sm:$0xff] }
  0x18   :  { %672 = vmatprep.subr.bf16.mxu1 %v671_v8  ;;  %v645_v17 = vpack.c.bf16 %v30_v15, %v29_v14  ;;  %v78_v19 = vld [vmem:[#allocation2 + $0x198] sm:$0xff]  ;;  %v61_v20 = vld [vmem:[#allocation2 + $0x110] sm:$0xff]  ;;  %v48_v24 = vld [vmem:[#allocation2 + $0xa8] sm:$0xff]  ;;  %644 = vmatprep.subr.bf16.mxu0 %v643_v16  ;;  %v103_v13 = vsub.s32 %v100_v63, %v102_v0 }
  0x19   :  { %674 = vmatpush3.bf16.msra.mxu1 %v673_v12  ;;  %v675_v21 = vpack.c.bf16 %v78_v19, %v77_v18  ;;  %v62_v22 = vld [vmem:[#allocation2 + $0x118] sm:$0xff]  ;;  %v647_v26 = vpack.c.bf16 %v48_v24, %v47_v23  ;;  %v31_v27 = vld [vmem:[#allocation2 + $0x20] sm:$0xff]  ;;  %v32_v28 = vld [vmem:[#allocation2 + $0x28] sm:$0xff] }
  0x1a   :  { %v677_v25 = vpack.c.bf16 %v62_v22, %v61_v20  ;;  %v79_v29 = vld [vmem:[#allocation2 + $0x1a0] sm:$0xff]  ;;  %v80_v30 = vld [vmem:[#allocation2 + $0x1a8] sm:$0xff]  ;;  %v649_v33 = vpack.c.bf16 %v32_v28, %v31_v27  ;;  %v49_v35 = vld [vmem:[#allocation2 + $0xb0] sm:$0xff] }
  0x1b   :  { %676 = vmatprep.subr.bf16.mxu1 %v675_v21  ;;  %v63_v31 = vld [vmem:[#allocation2 + $0x120] sm:$0xff]  ;;  %v64_v32 = vld [vmem:[#allocation2 + $0x128] sm:$0xff]  ;;  %646 = vmatpush3.bf16.msra.mxu0 %v645_v17  ;;  %v679_v34 = vpack.c.bf16 %v80_v30, %v79_v29  ;;  %v50_v36 = vld [vmem:[#allocation2 + $0xb8] sm:$0xff] }
  0x1c   :  { %v33_v37 = vld [vmem:[#allocation2 + $0x30] sm:$0xff]  ;;  %648 = vmatprep.subr.bf16.mxu0 %v647_v26  ;;  %v681_v38 = vpack.c.bf16 %v64_v32, %v63_v31  ;;  %v651_v39 = vpack.c.bf16 %v50_v36, %v49_v35  ;;  %v34_v40 = vld [vmem:[#allocation2 + $0x38] sm:$0xff]  ;;  %v51_v46 = vld [vmem:[#allocation2 + $0xc0] sm:$0xff] }
  0x1d   :  { %678 = vmatpush3.bf16.msra.mxu1 %v677_v25  ;;  %v81_v41 = vld [vmem:[#allocation2 + $0x1b0] sm:$0xff]  ;;  %v82_v42 = vld [vmem:[#allocation2 + $0x1b8] sm:$0xff]  ;;  %v52_v50 = vld [vmem:[#allocation2 + $0xc8] sm:$0xff]  ;;  %v653_v51 = vpack.c.bf16 %v34_v40, %v33_v37 }
  0x1e   :  { %680 = vmatprep.subr.bf16.mxu1 %v679_v34  ;;  %v683_v43 = vpack.c.bf16 %v82_v42, %v81_v41  ;;  %v65_v44 = vld [vmem:[#allocation2 + $0x130] sm:$0xff]  ;;  %v66_v45 = vld [vmem:[#allocation2 + $0x138] sm:$0xff]  ;;  %v83_v52 = vld [vmem:[#allocation2 + $0x1c0] sm:$0xff]  ;;  %v655_v55 = vpack.c.bf16 %v52_v50, %v51_v46 }
  0x1f   :  { %650 = vmatpush3.bf16.msra.mxu0 %v649_v33  ;;  %v84_v53 = vld [vmem:[#allocation2 + $0x1c8] sm:$0xff]  ;;  %v685_v54 = vpack.c.bf16 %v66_v45, %v65_v44  ;;  %v35_v56 = vld [vmem:[#allocation2 + $0x40] sm:$0xff]  ;;  %v53_v61 = vld [vmem:[#allocation2 + $0xd0] sm:$0xff] }
  0x20   :  { %652 = vmatprep.subr.bf16.mxu0 %v651_v39  ;;  %v36_v57 = vld [vmem:[#allocation2 + $0x48] sm:$0xff]  ;;  %v67_v58 = vld [vmem:[#allocation2 + $0x140] sm:$0xff]  ;;  %v687_v59 = vpack.c.bf16 %v84_v53, %v83_v52  ;;  %v54_v62 = vld [vmem:[#allocation2 + $0xd8] sm:$0xff] }
  0x21   :  { %682 = vmatpush3.bf16.msra.mxu1 %v681_v38  ;;  %v68_v60 = vld [vmem:[#allocation2 + $0x148] sm:$0xff]  ;;  %v85_v1 = vld [vmem:[#allocation2 + $0x1d0] sm:$0xff]  ;;  %v86_v2 = vld [vmem:[#allocation2 + $0x1d8] sm:$0xff]  ;;  %v657_v3 = vpack.c.bf16 %v36_v57, %v35_v56  ;;  %v659_v5 = vpack.c.bf16 %v54_v62, %v53_v61 }
  0x22   :  { %684 = vmatprep.subr.bf16.mxu1 %v683_v43  ;;  %v689_v4 = vpack.c.bf16 %v68_v60, %v67_v58  ;;  %v37_v6 = vld [vmem:[#allocation2 + $0x50] sm:$0xff]  ;;  %v38_v7 = vld [vmem:[#allocation2 + $0x58] sm:$0xff]  ;;  %v691_v9 = vpack.c.bf16 %v86_v2, %v85_v1  ;;  %v55_v11 = vld [vmem:[#allocation2 + $0xe0] sm:$0xff] }
  0x23   :  { %654 = vmatpush3.bf16.msra.mxu0 %v653_v51  ;;  %v69_v8 = vld [vmem:[#allocation2 + $0x150] sm:$0xff]  ;;  %v70_v10 = vld [vmem:[#allocation2 + $0x158] sm:$0xff]  ;;  %v56_v12 = vld [vmem:[#allocation2 + $0xe8] sm:$0xff]  ;;  %v661_v16 = vpack.c.bf16 %v38_v7, %v37_v6 }
  0x24   :  { %656 = vmatprep.subr.bf16.mxu0 %v655_v55  ;;  %v87_v14 = vld [vmem:[#allocation2 + $0x1e0] sm:$0xff]  ;;  %v88_v15 = vld [vmem:[#allocation2 + $0x1e8] sm:$0xff]  ;;  %v693_v18 = vpack.c.bf16 %v70_v10, %v69_v8  ;;  %v663_v19 = vpack.c.bf16 %v56_v12, %v55_v11  ;;  %v57_v25 = vld [vmem:[#allocation2 + $0xf0] sm:$0xff] }
  0x25   :  { %686 = vmatpush3.bf16.msra.mxu1 %v685_v54  ;;  %v39_v17 = vld [vmem:[#allocation2 + $0x60] sm:$0xff]  ;;  %v40_v20 = vld [vmem:[#allocation2 + $0x68] sm:$0xff]  ;;  %v695_v23 = vpack.c.bf16 %v88_v15, %v87_v14  ;;  %v58_v26 = vld [vmem:[#allocation2 + $0xf8] sm:$0xff] }
  0x26   :  { %688 = vmatprep.subr.bf16.mxu1 %v687_v59  ;;  %v71_v21 = vld [vmem:[#allocation2 + $0x160] sm:$0xff]  ;;  %v72_v24 = vld [vmem:[#allocation2 + $0x168] sm:$0xff]  ;;  %v89_v29 = vld [vmem:[#allocation2 + $0x1f0] sm:$0xff]  ;;  %v665_v31 = vpack.c.bf16 %v40_v20, %v39_v17  ;;  %v667_v35 = vpack.c.bf16 %v58_v26, %v57_v25 }
  0x27   :  { %658 = vmatpush3.bf16.msra.mxu0 %v657_v3  ;;  %v26_v22 = vld [vmem:[%s874_s0] sm:$0xff]  ;;  %v90_v30 = vld [vmem:[#allocation2 + $0x1f8] sm:$0xff]  ;;  %v697_v34 = vpack.c.bf16 %v72_v24, %v71_v21  ;;  %v41_v36 = vld [vmem:[#allocation2 + $0x70] sm:$0xff]  ;;  %s815_s0 = smov [#allocation5]  }
  0x28   :  { %660 = vmatprep.subr.bf16.mxu0 %v659_v5  ;;  %v104_v27 = vrot.slane %v26_v22, %v103_v13  ;;  %v97_v28 = vcombine.high %v26_v22, %v26_v22  ;;  %v42_v37 = vld [vmem:[#allocation2 + $0x78] sm:$0xff]  ;;  %v699_v38 = vpack.c.bf16 %v90_v30, %v89_v29  ;;  %v73_v39 = vld [vmem:[#allocation2 + $0x170] sm:$0xff]  ;;  %v261_v44 = vld [vmem:[#allocation2 + $0x208] sm:$0xff]  ;;  %v814_v5 = vmov 0.0   ;;  %s453_s24 = sshll.u32 %s815_s0, 4  ;;  %s454_s24 = int_to_ptr.vmem [resolvable:$true] %s453_s24 }
  0x29   :  { %690 = vmatpush3.bf16.msra.mxu1 %v689_v4  ;;  %v74_v40 = vld [vmem:[#allocation2 + $0x178] sm:$0xff]  ;;  %v669_v42 = vpack.c.bf16 %v42_v37, %v41_v36  ;;  %v262_v45 = vld [vmem:[#allocation2 + $0x210] sm:$0xff]  ;;  %v264_v49 = vld [vmem:[#allocation2 + $0x220] sm:$0xff]  ;;  %s782_s25 = scalar_lea.vmem %s454_s24, 32  ;;  %p787_p9 = scmp.lt.s32.totalorder %s454_s24, %s454_s24 }
  0x2a   :  { %692 = vmatprep.subr.bf16.mxu1 %v691_v9  ;;  %v112_v32 = vcombine.high %v104_v27, %v104_v27  ;;  %v111_v33 = vrot.slane %v97_v28, %v103_v13  ;;  %v701_v43 = vpack.c.bf16 %v74_v40, %v73_v39  ;;  %v704_v46 = vpack.c.bf16 %v262_v45, %v261_v44  ;;  %v263_v48 = vld [vmem:[#allocation2 + $0x218] sm:$0xff]  ;;  %v265_v51 = vld [vmem:[#allocation2 + $0x228] sm:$0xff]  ;;  %v266_v52 = vld [vmem:[#allocation2 + $0x230] sm:$0xff]  ;;  %p783_p8 = scmp.ne.s32.totalorder %s454_s24, %s782_s25  ;;  %p788_p10 = scmp.lt.s32.totalorder %s782_s25, %s782_s25 }
  0x2b   :  { %662 = vmatpush3.bf16.msra.mxu0 %v661_v16  ;;  %v707_v50 = vpack.c.bf16 %v264_v49, %v263_v48  ;;  %v710_v53 = vpack.c.bf16 %v266_v52, %v265_v51  ;;  %v267_v54 = vld [vmem:[#allocation2 + $0x238] sm:$0xff]  ;;  %v268_v55 = vld [vmem:[#allocation2 + $0x240] sm:$0xff]  ;;  %v269_v57 = vld [vmem:[#allocation2 + $0x248] sm:$0xff] }
  0x2c   :  { %664 = vmatprep.subr.bf16.mxu0 %v663_v19  ;;  %182 = vmatprep.mubr.f32.mxu0 %v112_v32  ;;  %v113_v41 = vcombine.high %v111_v33, %v111_v33  ;;  %v713_v56 = vpack.c.bf16 %v268_v55, %v267_v54  ;;  %v270_v58 = vld [vmem:[#allocation2 + $0x250] sm:$0xff]  ;;  %v271_v60 = vld [vmem:[#allocation2 + $0x258] sm:$0xff]  ;;  %v272_v61 = vld [vmem:[#allocation2 + $0x260] sm:$0xff]  ;;  %p789_p11 = por %p788_p10, %p787_p9 }
  0x2d   :  { %694 = vmatpush3.bf16.msra.mxu1 %v693_v18  ;;  %v716_v59 = vpack.c.bf16 %v270_v58, %v269_v57  ;;  %v719_v62 = vpack.c.bf16 %v272_v61, %v271_v60  ;;  %v273_v63 = vld [vmem:[#allocation2 + $0x268] sm:$0xff]  ;;  %v274_v0 = vld [vmem:[#allocation2 + $0x270] sm:$0xff]  ;;  %v275_v2 = vld [vmem:[#allocation2 + $0x278] sm:$0xff] }
  0x2e   :  { %696 = vmatprep.subr.bf16.mxu1 %v695_v23  ;;  %252 = vmatprep.mubr.f32.mxu1 %v113_v41  ;;  %v722_v1 = vpack.c.bf16 %v274_v0, %v273_v63  ;;  %v276_v3 = vld [vmem:[#allocation2 + $0x280] sm:$0xff]  ;;  %v355_v6 = vld [vmem:[#allocation2 + $0x290] sm:$0xff]  ;;  %v356_v7 = vld [vmem:[#allocation2 + $0x298] sm:$0xff]  ;;  %p790_p12 = pnand %p789_p11, %p783_p8 }
  0x2f   :  { %666 = vmatpush3.bf16.msra.mxu0 %v665_v31  ;;  %v725_v4 = vpack.c.bf16 %v276_v3, %v275_v2  ;;  %v357_v8 = vld [vmem:[#allocation2 + $0x2a0] sm:$0xff]  ;;  %v728_v9 = vpack.c.bf16 %v356_v7, %v355_v6  ;;  %v358_v10 = vld [vmem:[#allocation2 + $0x2a8] sm:$0xff]  ;;  %v359_v12 = vld [vmem:[#allocation2 + $0x2b0] sm:$0xff] }
  0x30   :  { %668 = vmatprep.subr.bf16.mxu0 %v667_v35  ;;  %v731_v11 = vpack.c.bf16 %v358_v10, %v357_v8  ;;  %v360_v13 = vld [vmem:[#allocation2 + $0x2b8] sm:$0xff]  ;;  %v361_v15 = vld [vmem:[#allocation2 + $0x2c0] sm:$0xff]  ;;  %v362_v16 = vld [vmem:[#allocation2 + $0x2c8] sm:$0xff] }
  0x31   :  { %698 = vmatpush3.bf16.msra.mxu1 %v697_v34  ;;  %v734_v14 = vpack.c.bf16 %v360_v13, %v359_v12  ;;  %v737_v17 = vpack.c.bf16 %v362_v16, %v361_v15  ;;  %v363_v18 = vld [vmem:[#allocation2 + $0x2d0] sm:$0xff]  ;;  %v364_v19 = vld [vmem:[#allocation2 + $0x2d8] sm:$0xff]  ;;  %v365_v21 = vld [vmem:[#allocation2 + $0x2e0] sm:$0xff] }
  0x32   :  { %700 = vmatprep.subr.bf16.mxu1 %v699_v38  ;;  %v740_v20 = vpack.c.bf16 %v364_v19, %v363_v18  ;;  %v366_v22 = vld [vmem:[#allocation2 + $0x2e8] sm:$0xff]  ;;  %v367_v24 = vld [vmem:[#allocation2 + $0x2f0] sm:$0xff]  ;;  %v368_v25 = vld [vmem:[#allocation2 + $0x2f8] sm:$0xff] }
  0x33   :  { %670 = vmatpush3.bf16.msra.mxu0 %v669_v42  ;;  %v743_v23 = vpack.c.bf16 %v366_v22, %v365_v21  ;;  %v746_v26 = vpack.c.bf16 %v368_v25, %v367_v24  ;;  %v462_v28 = vld [vmem:[#allocation2 + $0x200] ss:$0 sm:$0xff]  ;;  %v370_v39 = vld [vmem:[#allocation2 + $0x308] sm:$0xff] }
  0x34   :  { %703 = vmatprep.subr.bf16.mxu0 %v812_v47  ;;  %v369_v38 = vld [vmem:[#allocation2 + $0x300] sm:$0xff]  ;;  %v463_v41 = vld [vmem:[#allocation2 + $0x288] ss:$0 sm:$0xff] }
  0x35   :  { %702 = vmatpush3.bf16.msra.mxu1 %v701_v43  ;;  %v749_v40 = vpack.c.bf16 %v370_v39, %v369_v38 }
  0x36   :  { %727 = vmatprep.subr.bf16.mxu1 %v812_v47  ;;  %183 = vmatmul.mubr.f32.vlgmr.msra.gmra.mrb[0].mxu0 %v104_v27 }
  0x37   :  { %705 = vmatpush3.bf16.msra.mxu0 %v704_v46  ;;  %601 = vmatprep.mubr.msk.f32.mxu0 %vm813_vm0, %v814_v5 }
  0x38   :  { %253 = vmatmul.mubr.f32.vlgmr.msra.gmra.mrb[0].mxu1 %v111_v33  ;;  %706 = vmatprep.subr.bf16.mxu0 %v812_v47 }
  0x39   :  { %636 = vmatprep.mubr.msk.f32.mxu1 %vm813_vm0, %v814_v5  ;;  %729 = vmatpush3.bf16.msra.mxu1 %v728_v9 }
  0x3a   :  { %730 = vmatprep.subr.bf16.mxu1 %v812_v47 }
  0x3b   :  { %708 = vmatpush3.bf16.msra.mxu0 %v707_v50 }
  0x3c   :  { %709 = vmatprep.subr.bf16.mxu0 %v812_v47 }
  0x3d   :  { %732 = vmatpush3.bf16.msra.mxu1 %v731_v11 }
  0x3e   :  { %733 = vmatprep.subr.bf16.mxu1 %v812_v47 }
  0x3f   :  { %711 = vmatpush3.bf16.msra.mxu0 %v710_v53 }
  0x40   :  { %712 = vmatprep.subr.bf16.mxu0 %v812_v47 }
  0x41   :  { %735 = vmatpush3.bf16.msra.mxu1 %v734_v14 }
  0x42   :  { %736 = vmatprep.subr.bf16.mxu1 %v812_v47 }
  0x43   :  { %714 = vmatpush3.bf16.msra.mxu0 %v713_v56 }
  0x44   :  { %715 = vmatprep.subr.bf16.mxu0 %v812_v47 }
  0x45   :  { %738 = vmatpush3.bf16.msra.mxu1 %v737_v17 }
  0x46   :  { %739 = vmatprep.subr.bf16.mxu1 %v812_v47 }
  0x47   :  { %717 = vmatpush3.bf16.msra.mxu0 %v716_v59 }
  0x48   :  { %718 = vmatprep.subr.bf16.mxu0 %v812_v47 }
  0x49   :  { %741 = vmatpush3.bf16.msra.mxu1 %v740_v20 }
  0x4a   :  { %742 = vmatprep.subr.bf16.mxu1 %v812_v47 }
  0x4b   :  { %720 = vmatpush3.bf16.msra.mxu0 %v719_v62 }
  0x4c   :  { %721 = vmatprep.subr.bf16.mxu0 %v812_v47 }
  0x4d   :  { %744 = vmatpush3.bf16.msra.mxu1 %v743_v23 }
  0x4e   :  { %745 = vmatprep.subr.bf16.mxu1 %v812_v47 }
  0x4f   :  { %723 = vmatpush3.bf16.msra.mxu0 %v722_v1 }
  0x50   :  { %724 = vmatprep.subr.bf16.mxu0 %v812_v47 }
  0x51   :  { %747 = vmatpush3.bf16.msra.mxu1 %v746_v26 }
  0x52   :  { %748 = vmatprep.subr.bf16.mxu1 %v812_v47  ;;  %v464_v47 = vld [vmem:[#allocation2 + $0x310] ss:$0 sm:$0xff] }
  0x53   :  { %726 = vmatpush3.bf16.msra.mxu0 %v725_v4 }
  0x55   :  { %750 = vmatpush3.bf16.msra.mxu1 %v749_v40 }
 0x109   :  { %v497_v27 = vpop.f32.mrb[0].mxu0 }
 0x10a   :  { %v498_v29 = vpop.f32.mrb[1].mxu0 }
 0x10b   :  { %v532_v30 = vpop.f32.mrb[0].mxu1  ;;  %v499_v31 = vadd.f32 %v498_v29, %v497_v27 }
 0x10c   :  { %v533_v32 = vpop.f32.mrb[1].mxu1 }
 0x10d   :  { %v534_v33 = vadd.f32 %v533_v32, %v532_v30  ;;  %v185_v34 = vadd.f32 %v499_v31, %v462_v28 }
 0x10f   :  { %v255_v35 = vadd.f32 %v534_v33, %v185_v34 }
 0x111   :  { %v259_v36 = vmul.f32 0.01, %v255_v35  ;;  %vm258_vm1 = vcmp.ge.f32.partialorder %v255_v35, 0.0 }
 0x113   :  { %v260_v37 = vsel %vm258_vm1, %v255_v35, %v259_v36 }
 0x114   :  { %602 = vmatmul.mubr.f32.vlgmr.msra.gmra.mrb[2].mxu0 %v260_v37 }
 0x1e7   :  { %v348_v42 = vpop.f32.mrb[2].mxu0 }
 0x1e8   :  { %v349_v43 = vadd.f32 %v463_v41, %v348_v42  ;;  %v603_v44 = vpop.f32.mrb[3].mxu0 }
 0x1ea   :  { %vm352_vm2 = vcmp.ge.f32.partialorder %v349_v43, 0.0  ;;  %v353_v45 = vmul.f32 0.01, %v349_v43 }
 0x1ec   :  { %v354_v46 = vsel %vm352_vm2, %v349_v43, %v353_v45 }
 0x1ed   :  { %637 = vmatmul.mubr.f32.vlgmr.msra.gmra.mrb[2].mxu1 %v354_v46 }
 0x2c0   :  { %v442_v48 = vpop.f32.mrb[2].mxu1 }
 0x2c1   :  { %v443_v49 = vadd.f32 %v464_v47, %v442_v48  ;;  %v638_v50 = vpop.f32.mrb[3].mxu1 }
 0x2c3   :  { %446 = vst [vmem:[#allocation5] sm:$0x3] %v443_v49 }
 0x2c4   :  { %793 = shalt.err (!%p790_p12)
}
 0x2c5   :  { %s794_s28 = scalar_lea.hbm %s876_s2, 32 }
 0x2c6   :  { %p795_p13 = scmp.ne.s32.totalorder %s876_s2, %s794_s28  ;;  %p798_p0 = scmp.lt.u32.totalorder %s794_s28, %s876_s2 }
 0x2c8   :  { %p800_p1 = pnand %p798_p0, %p795_p13 }
 0x2ca   :  { %803 = shalt.err (!%p800_p1)
}
 0x2cb   :  { %456 = dma.vmem_to_hbm [thread:$0]  %s454_s24, 32, %s876_s2, [#allocation4]  }
 0x2cc   :  { %806 = dma.done.wait [#allocation4], 32  }
 0x2cd   :  { %807 = vsyncadd [#allocation4], 4294967264 }
 0x2ce   :  { %460 = vsyncpa [#allocation3], 1 }
 0x2cf   :  { %461 = vsyncpa [#allocation4], 1 }

</bundles_post_ra>
